<compile_context>
chip_gen: v7x
topology: tpu7x:2x2x1
jax: 0.10.0
libtpu: 0.0.40
codegen_flags: <defaults>
</compile_context>

<pallas_src>
import functools

import jax
import jax.numpy as jnp
from jax.experimental import pallas as pl
from jax.experimental.pallas import tpu as pltpu


def _round_up(x, m):
    return (x + m - 1) // m * m


def _conv_stats_kernel(x_ref, w_ref, mask_ref, y_ref, sum_ref, ssq_ref, *,
                       tap_offsets, l_out):
    """Pass 1: per-image conv (KH*KW flat-shifted matmuls) + masked BN partial stats.

    x_ref:    (1, Cin_p, Lx)         padded, flattened activation of image n
    w_ref:    (KH*KW, Cout_p, Cin_p) per-tap weight matrices
    mask_ref: (1, L_out)             1.0 for valid output columns, 0.0 for garbage cols
    y_ref:    (1, Cout_p, L_out)     conv output (transposed, lane-dense layout)
    sum_ref:  (Cout_p, 1)            running per-channel sum   (accumulated over grid)
    ssq_ref:  (Cout_p, 1)            running per-channel sum of squares
    """
    n = pl.program_id(0)

    @pl.when(n == 0)
    def _init():
        sum_ref[...] = jnp.zeros_like(sum_ref)
        ssq_ref[...] = jnp.zeros_like(ssq_ref)

    cout_p = w_ref.shape[1]
    acc = jnp.zeros((cout_p, l_out), jnp.float32)
    # Static (unrolled) loop over the KH*KW taps; each tap is a contiguous
    # flat-offset slice of the padded activation -> one small MXU matmul.
    for t, off in enumerate(tap_offsets):
        x_tap = x_ref[0, :, pl.ds(off, l_out)]                  # (Cin_p, L_out)
        acc = acc + jnp.dot(w_ref[t], x_tap,
                            preferred_element_type=jnp.float32)  # (Cout_p, L_out)

    y_ref[0, :, :] = acc

    m = mask_ref[...]                                            # (1, L_out)
    ym = acc * m                                                 # zero padded columns
    sum_ref[...] += jnp.sum(ym, axis=1, keepdims=True)
    ssq_ref[...] += jnp.sum(ym * acc, axis=1, keepdims=True)


def _bn_prelu_kernel(y_ref, sum_ref, ssq_ref, g_ref, b_ref, a_ref, o_ref, *,
                     inv_count, eps):
    """Pass 2: finalize batch stats, apply BN affine + per-channel PReLU."""
    y = y_ref[0, :, :]                                           # (Cout_p, L_out)
    mean = sum_ref[...] * inv_count                              # (Cout_p, 1)
    var = ssq_ref[...] * inv_count - mean * mean                 # biased variance
    scale = jax.lax.rsqrt(var + eps) * g_ref[...]
    yn = (y - mean) * scale + b_ref[...]
    o_ref[0, :, :] = jnp.where(yn > 0, yn, a_ref[...] * yn)


def conv_bn_prelu(x_nchw, weight, bias, gamma, beta, alpha, *,
                  stride=1, padding=1, dilation=1, eps=1e-5,
                  compute_dtype=jnp.float32):
    """Forward pass of ConvBnPRelu (train-mode BatchNorm batch statistics).

    x_nchw: (N, Cin, H, W); weight: (Cout, Cin, KH, KW).  Returns (N, Cout, Hout, Wout).
    `bias` is accepted for API parity but is mathematically cancelled by the train-mode
    BatchNorm mean subtraction, so it is not used in the compute.
    """
    if stride != 1:
        # TODO(synk): stride > 1 breaks the constant flat-offset tap trick; only the
        # module default (stride=1) is implemented here.
        raise NotImplementedError("Pallas ConvBnPRelu supports stride=1 only")
    del bias  # exactly cancelled by train-mode BN mean subtraction.

    N, Cin, H, W = x_nchw.shape
    Cout, _, KH, KW = weight.shape

    Hout = (H + 2 * padding - dilation * (KH - 1) - 1) // stride + 1
    Wout = (W + 2 * padding - dilation * (KW - 1) - 1) // stride + 1
    Hp, Wp = H + 2 * padding, W + 2 * padding

    Cin_p = _round_up(Cin, 8)                 # sublane-aligned channels
    Cout_p = _round_up(Cout, 8)
    L_out = Hout * Wp                         # flat output positions per image
    max_off = (KH - 1) * dilation * Wp + (KW - 1) * dilation
    Lx = _round_up(max(Hp * Wp, L_out + max_off), 128)

    # ---- glue (plain JAX, no data blow-up): zero-pad channels+spatial, flatten ----
    xp = jnp.pad(x_nchw.astype(compute_dtype),
                 ((0, 0), (0, Cin_p - Cin), (padding, padding), (padding, padding)))
    xflat = xp.reshape(N, Cin_p, Hp * Wp)
    xflat = jnp.pad(xflat, ((0, 0), (0, 0), (0, Lx - Hp * Wp)))

    # Per-tap weight matrices (Cout_p, Cin_p); tap order t = kh*KW + kw.
    w_taps = jnp.transpose(weight, (2, 3, 0, 1)).reshape(KH * KW, Cout, Cin)
    w_taps = jnp.pad(w_taps, ((0, 0), (0, Cout_p - Cout), (0, Cin_p - Cin)))
    w_taps = w_taps.astype(compute_dtype)
    tap_offsets = tuple(kh * dilation * Wp + kw * dilation
                        for kh in range(KH) for kw in range(KW))

    # Validity mask over the flat output axis (garbage columns: (m % Wp) >= Wout).
    mask = ((jnp.arange(L_out) % Wp) < Wout).astype(jnp.float32).reshape(1, L_out)

    def _pad_param(p):
        p = p.astype(jnp.float32).reshape(-1)
        return jnp.pad(p, (0, Cout_p - Cout)).reshape(Cout_p, 1)

    gamma_p, beta_p, alpha_p = _pad_param(gamma), _pad_param(beta), _pad_param(alpha)

    # ---- pass 1: conv (fused im2col) + per-channel sum / sumsq across the batch ----
    y_all, ssum, ssq = pl.pallas_call(
        functools.partial(_conv_stats_kernel, tap_offsets=tap_offsets, l_out=L_out),
        grid=(N,),
        in_specs=[
            pl.BlockSpec((1, Cin_p, Lx), lambda n: (n, 0, 0)),
            pl.BlockSpec((KH * KW, Cout_p, Cin_p), lambda n: (0, 0, 0)),
            pl.BlockSpec((1, L_out), lambda n: (0, 0)),
        ],
        out_specs=[
            pl.BlockSpec((1, Cout_p, L_out), lambda n: (n, 0, 0)),
            pl.BlockSpec((Cout_p, 1), lambda n: (0, 0)),
            pl.BlockSpec((Cout_p, 1), lambda n: (0, 0)),
        ],
        out_shape=[
            jax.ShapeDtypeStruct((N, Cout_p, L_out), jnp.float32),
            jax.ShapeDtypeStruct((Cout_p, 1), jnp.float32),
            jax.ShapeDtypeStruct((Cout_p, 1), jnp.float32),
        ],
        compiler_params=pltpu.CompilerParams(
            # Stats accumulate across the batch axis -> must be sequential.
            dimension_semantics=("arbitrary",)),
    )(xflat, w_taps, mask)

    # ---- pass 2: finalize BN + affine + PReLU (elementwise, per-image blocks) ----
    count = N * Hout * Wout
    out_flat = pl.pallas_call(
        functools.partial(_bn_prelu_kernel, inv_count=1.0 / count, eps=eps),
        grid=(N,),
        in_specs=[
            pl.BlockSpec((1, Cout_p, L_out), lambda n: (n, 0, 0)),
            pl.BlockSpec((Cout_p, 1), lambda n: (0, 0)),
            pl.BlockSpec((Cout_p, 1), lambda n: (0, 0)),
            pl.BlockSpec((Cout_p, 1), lambda n: (0, 0)),
            pl.BlockSpec((Cout_p, 1), lambda n: (0, 0)),
            pl.BlockSpec((Cout_p, 1), lambda n: (0, 0)),
        ],
        out_specs=pl.BlockSpec((1, Cout_p, L_out), lambda n: (n, 0, 0)),
        out_shape=jax.ShapeDtypeStruct((N, Cout_p, L_out), jnp.float32),
        compiler_params=pltpu.CompilerParams(
            dimension_semantics=("parallel",)),   # independent per image (megacore)
    )(y_all, ssum, ssq, gamma_p, beta_p, alpha_p)

    # (N, Cout_p, Hout*Wp) -> NCHW, dropping channel padding and garbage columns.
    return out_flat.reshape(N, Cout_p, Hout, Wp)[:, :Cout, :, :Wout]


def _reference(x_nchw, weight, bias, gamma, beta, alpha, eps=1e-5):
    # Pure-JAX reference (same math as the PyTorch module, no Pallas).
    y = jax.lax.conv_general_dilated(
        x_nchw.astype(jnp.float32), weight.astype(jnp.float32),
        window_strides=(1, 1), padding=((1, 1), (1, 1)),
        dimension_numbers=("NCHW", "OIHW", "NCHW"))
    y = y + bias.reshape(1, -1, 1, 1)
    mean = jnp.mean(y, axis=(0, 2, 3), keepdims=True)
    var = jnp.mean((y - mean) ** 2, axis=(0, 2, 3), keepdims=True)
    y = (y - mean) * jax.lax.rsqrt(var + eps)
    y = y * gamma.reshape(1, -1, 1, 1) + beta.reshape(1, -1, 1, 1)
    return jnp.where(y > 0, y, alpha.reshape(1, -1, 1, 1) * y)


if __name__ == "__main__":
    key = jax.random.PRNGKey(0)
    k_x, k_w, k_b = jax.random.split(key, 3)

    N, Cin, H, W = 2, 4, 16, 16
    Cout, KH, KW = 8, 3, 3

    x = jax.random.normal(k_x, (N, Cin, H, W), dtype=jnp.float32)

    # Deterministic parameter init (shapes per nn.Conv2d / nn.BatchNorm2d / nn.PReLU defaults).
    fan_in = Cin * KH * KW
    weight = jax.random.normal(k_w, (Cout, Cin, KH, KW), dtype=jnp.float32) / jnp.sqrt(fan_in)
    bias = jax.random.normal(k_b, (Cout,), dtype=jnp.float32) * 0.1
    gamma = jnp.ones((Cout,), dtype=jnp.float32)        # BatchNorm2d weight default
    beta = jnp.zeros((Cout,), dtype=jnp.float32)        # BatchNorm2d bias default
    alpha = jnp.full((Cout,), 0.25, dtype=jnp.float32)  # PReLU default

    fwd = jax.jit(conv_bn_prelu)
    out = jax.block_until_ready(fwd(x, weight, bias, gamma, beta, alpha))

    ref = jax.block_until_ready(_reference(x, weight, bias, gamma, beta, alpha))
    assert out.shape == (N, Cout, H, W)
    assert jnp.allclose(out, ref, rtol=1e-3, atol=1e-3), "mismatch vs reference"

    print("KERNEL_OK")
</pallas_src>

<mosaic_0001>
module attributes {stable_mosaic.version = 11 : i64} {
  func.func @_conv_stats_kernel(%arg0: i32, %arg1: memref<1x8x384xf32, #tpu.memory_space<vmem>>, %arg2: memref<9x8x8xf32, #tpu.memory_space<vmem>>, %arg3: memref<1x288xf32, #tpu.memory_space<vmem>>, %arg4: memref<1x8x288xf32, #tpu.memory_space<vmem>>, %arg5: memref<8x1xf32, #tpu.memory_space<vmem>>, %arg6: memref<8x1xf32, #tpu.memory_space<vmem>>) attributes {dimension_semantics = [#tpu.dimension_semantics<arbitrary>], iteration_bounds = array<i64: 2>, scalar_prefetch = 0 : i64, scratch_operands = 0 : i64, tpu.core_type = #tpu.core_type<tc>, window_params = [{transform_indices = @transform_0, window_bounds = array<i64: 1, 8, 384>}, {pipeline_mode = #tpu.pipeline_mode<synchronous>, transform_indices = @transform_1, window_bounds = array<i64: 9, 8, 8>}, {pipeline_mode = #tpu.pipeline_mode<synchronous>, transform_indices = @transform_2, window_bounds = array<i64: 1, 288>}, {transform_indices = @transform_3, window_bounds = array<i64: 1, 8, 288>}, {pipeline_mode = #tpu.pipeline_mode<synchronous>, transform_indices = @transform_4, window_bounds = array<i64: 8, 1>}, {pipeline_mode = #tpu.pipeline_mode<synchronous>, transform_indices = @transform_5, window_bounds = array<i64: 8, 1>}]} {
    %c0_i32 = arith.constant 0 : i32
    %0 = arith.cmpi eq, %arg0, %c0_i32 : i32
    %1 = arith.extui %0 : i1 to i32
    %c0_i32_0 = arith.constant 0 : i32
    %2 = arith.cmpi ne, %1, %c0_i32_0 : i32
    scf.if %2 {
      %cst_64 = arith.constant 0.000000e+00 : f32
      %75 = vector.broadcast %cst_64 : f32 to vector<8x1xf32>
      %c0_65 = arith.constant 0 : index
      %c0_66 = arith.constant 0 : index
      %76 = vector.load %arg5[%c0_65, %c0_66] : memref<8x1xf32, #tpu.memory_space<vmem>>, vector<8x1xf32>
      tpu.vector_store %arg5[%c0_65, %c0_66], %75 {strides = array<i32>} : memref<8x1xf32, #tpu.memory_space<vmem>>, vector<8x1xf32>,
      %cst_67 = arith.constant 0.000000e+00 : f32
      %77 = vector.broadcast %cst_67 : f32 to vector<8x1xf32>
      %c0_68 = arith.constant 0 : index
      %c0_69 = arith.constant 0 : index
      %78 = vector.load %arg6[%c0_68, %c0_69] : memref<8x1xf32, #tpu.memory_space<vmem>>, vector<8x1xf32>
      tpu.vector_store %arg6[%c0_68, %c0_69], %77 {strides = array<i32>} : memref<8x1xf32, #tpu.memory_space<vmem>>, vector<8x1xf32>,
    } else {
    }
    %cst = arith.constant 0.000000e+00 : f32
    %3 = vector.broadcast %cst : f32 to vector<8x288xf32>
    %c0 = arith.constant 0 : index
    %c0_1 = arith.constant 0 : index
    %c0_2 = arith.constant 0 : index
    %4 = vector.load %arg1[%c0, %c0_1, %c0_2] : memref<1x8x384xf32, #tpu.memory_space<vmem>>, vector<1x8x288xf32>
    %5 = vector.shape_cast %4 : vector<1x8x288xf32> to vector<8x288xf32>
    %c0_3 = arith.constant 0 : index
    %c0_4 = arith.constant 0 : index
    %c0_5 = arith.constant 0 : index
    %6 = vector.load %arg2[%c0_3, %c0_4, %c0_5] : memref<9x8x8xf32, #tpu.memory_space<vmem>>, vector<1x8x8xf32>
    %7 = vector.shape_cast %6 : vector<1x8x8xf32> to vector<8x8xf32>
    %cst_6 = arith.constant dense<0.000000e+00> : vector<8x288xf32>
    %8 = tpu.matmul %7, %5, %cst_6 {dimension_numbers = #tpu.dot_dimension_numbers<[1], [0], [0], [1], [0, 0, 1, 1], [], []>} : vector<8x8xf32>, vector<8x288xf32>, vector<8x288xf32> -> vector<8x288xf32>
    %9 = arith.addf %3, %8 : vector<8x288xf32>
    %c0_7 = arith.constant 0 : index
    %c0_8 = arith.constant 0 : index
    %c1 = arith.constant 1 : index
    %10 = vector.load %arg1[%c0_7, %c0_8, %c1] : memref<1x8x384xf32, #tpu.memory_space<vmem>>, vector<1x8x288xf32>
    %11 = vector.shape_cast %10 : vector<1x8x288xf32> to vector<8x288xf32>
    %c1_9 = arith.constant 1 : index
    %c0_10 = arith.constant 0 : index
    %c0_11 = arith.constant 0 : index
    %12 = vector.load %arg2[%c1_9, %c0_10, %c0_11] : memref<9x8x8xf32, #tpu.memory_space<vmem>>, vector<1x8x8xf32>
    %13 = vector.shape_cast %12 : vector<1x8x8xf32> to vector<8x8xf32>
    %cst_12 = arith.constant dense<0.000000e+00> : vector<8x288xf32>
    %14 = tpu.matmul %13, %11, %cst_12 {dimension_numbers = #tpu.dot_dimension_numbers<[1], [0], [0], [1], [0, 0, 1, 1], [], []>} : vector<8x8xf32>, vector<8x288xf32>, vector<8x288xf32> -> vector<8x288xf32>
    %15 = arith.addf %9, %14 : vector<8x288xf32>
    %c0_13 = arith.constant 0 : index
    %c0_14 = arith.constant 0 : index
    %c2 = arith.constant 2 : index
    %16 = vector.load %arg1[%c0_13, %c0_14, %c2] : memref<1x8x384xf32, #tpu.memory_space<vmem>>, vector<1x8x288xf32>
    %17 = vector.shape_cast %16 : vector<1x8x288xf32> to vector<8x288xf32>
    %c2_15 = arith.constant 2 : index
    %c0_16 = arith.constant 0 : index
    %c0_17 = arith.constant 0 : index
    %18 = vector.load %arg2[%c2_15, %c0_16, %c0_17] : memref<9x8x8xf32, #tpu.memory_space<vmem>>, vector<1x8x8xf32>
    %19 = vector.shape_cast %18 : vector<1x8x8xf32> to vector<8x8xf32>
    %cst_18 = arith.constant dense<0.000000e+00> : vector<8x288xf32>
    %20 = tpu.matmul %19, %17, %cst_18 {dimension_numbers = #tpu.dot_dimension_numbers<[1], [0], [0], [1], [0, 0, 1, 1], [], []>} : vector<8x8xf32>, vector<8x288xf32>, vector<8x288xf32> -> vector<8x288xf32>
    %21 = arith.addf %15, %20 : vector<8x288xf32>
    %c0_19 = arith.constant 0 : index
    %c0_20 = arith.constant 0 : index
    %c18 = arith.constant 18 : index
    %22 = vector.load %arg1[%c0_19, %c0_20, %c18] : memref<1x8x384xf32, #tpu.memory_space<vmem>>, vector<1x8x288xf32>
    %23 = vector.shape_cast %22 : vector<1x8x288xf32> to vector<8x288xf32>
    %c3 = arith.constant 3 : index
    %c0_21 = arith.constant 0 : index
    %c0_22 = arith.constant 0 : index
    %24 = vector.load %arg2[%c3, %c0_21, %c0_22] : memref<9x8x8xf32, #tpu.memory_space<vmem>>, vector<1x8x8xf32>
    %25 = vector.shape_cast %24 : vector<1x8x8xf32> to vector<8x8xf32>
    %cst_23 = arith.constant dense<0.000000e+00> : vector<8x288xf32>
    %26 = tpu.matmul %25, %23, %cst_23 {dimension_numbers = #tpu.dot_dimension_numbers<[1], [0], [0], [1], [0, 0, 1, 1], [], []>} : vector<8x8xf32>, vector<8x288xf32>, vector<8x288xf32> -> vector<8x288xf32>
    %27 = arith.addf %21, %26 : vector<8x288xf32>
    %c0_24 = arith.constant 0 : index
    %c0_25 = arith.constant 0 : index
    %c19 = arith.constant 19 : index
    %28 = vector.load %arg1[%c0_24, %c0_25, %c19] : memref<1x8x384xf32, #tpu.memory_space<vmem>>, vector<1x8x288xf32>
    %29 = vector.shape_cast %28 : vector<1x8x288xf32> to vector<8x288xf32>
    %c4 = arith.constant 4 : index
    %c0_26 = arith.constant 0 : index
    %c0_27 = arith.constant 0 : index
    %30 = vector.load %arg2[%c4, %c0_26, %c0_27] : memref<9x8x8xf32, #tpu.memory_space<vmem>>, vector<1x8x8xf32>
    %31 = vector.shape_cast %30 : vector<1x8x8xf32> to vector<8x8xf32>
    %cst_28 = arith.constant dense<0.000000e+00> : vector<8x288xf32>
    %32 = tpu.matmul %31, %29, %cst_28 {dimension_numbers = #tpu.dot_dimension_numbers<[1], [0], [0], [1], [0, 0, 1, 1], [], []>} : vector<8x8xf32>, vector<8x288xf32>, vector<8x288xf32> -> vector<8x288xf32>
    %33 = arith.addf %27, %32 : vector<8x288xf32>
    %c0_29 = arith.constant 0 : index
    %c0_30 = arith.constant 0 : index
    %c20 = arith.constant 20 : index
    %34 = vector.load %arg1[%c0_29, %c0_30, %c20] : memref<1x8x384xf32, #tpu.memory_space<vmem>>, vector<1x8x288xf32>
    %35 = vector.shape_cast %34 : vector<1x8x288xf32> to vector<8x288xf32>
    %c5 = arith.constant 5 : index
    %c0_31 = arith.constant 0 : index
    %c0_32 = arith.constant 0 : index
    %36 = vector.load %arg2[%c5, %c0_31, %c0_32] : memref<9x8x8xf32, #tpu.memory_space<vmem>>, vector<1x8x8xf32>
    %37 = vector.shape_cast %36 : vector<1x8x8xf32> to vector<8x8xf32>
    %cst_33 = arith.constant dense<0.000000e+00> : vector<8x288xf32>
    %38 = tpu.matmul %37, %35, %cst_33 {dimension_numbers = #tpu.dot_dimension_numbers<[1], [0], [0], [1], [0, 0, 1, 1], [], []>} : vector<8x8xf32>, vector<8x288xf32>, vector<8x288xf32> -> vector<8x288xf32>
    %39 = arith.addf %33, %38 : vector<8x288xf32>
    %c0_34 = arith.constant 0 : index
    %c0_35 = arith.constant 0 : index
    %c36 = arith.constant 36 : index
    %40 = vector.load %arg1[%c0_34, %c0_35, %c36] : memref<1x8x384xf32, #tpu.memory_space<vmem>>, vector<1x8x288xf32>
    %41 = vector.shape_cast %40 : vector<1x8x288xf32> to vector<8x288xf32>
    %c6 = arith.constant 6 : index
    %c0_36 = arith.constant 0 : index
    %c0_37 = arith.constant 0 : index
    %42 = vector.load %arg2[%c6, %c0_36, %c0_37] : memref<9x8x8xf32, #tpu.memory_space<vmem>>, vector<1x8x8xf32>
    %43 = vector.shape_cast %42 : vector<1x8x8xf32> to vector<8x8xf32>
    %cst_38 = arith.constant dense<0.000000e+00> : vector<8x288xf32>
    %44 = tpu.matmul %43, %41, %cst_38 {dimension_numbers = #tpu.dot_dimension_numbers<[1], [0], [0], [1], [0, 0, 1, 1], [], []>} : vector<8x8xf32>, vector<8x288xf32>, vector<8x288xf32> -> vector<8x288xf32>
    %45 = arith.addf %39, %44 : vector<8x288xf32>
    %c0_39 = arith.constant 0 : index
    %c0_40 = arith.constant 0 : index
    %c37 = arith.constant 37 : index
    %46 = vector.load %arg1[%c0_39, %c0_40, %c37] : memref<1x8x384xf32, #tpu.memory_space<vmem>>, vector<1x8x288xf32>
    %47 = vector.shape_cast %46 : vector<1x8x288xf32> to vector<8x288xf32>
    %c7 = arith.constant 7 : index
    %c0_41 = arith.constant 0 : index
    %c0_42 = arith.constant 0 : index
    %48 = vector.load %arg2[%c7, %c0_41, %c0_42] : memref<9x8x8xf32, #tpu.memory_space<vmem>>, vector<1x8x8xf32>
    %49 = vector.shape_cast %48 : vector<1x8x8xf32> to vector<8x8xf32>
    %cst_43 = arith.constant dense<0.000000e+00> : vector<8x288xf32>
    %50 = tpu.matmul %49, %47, %cst_43 {dimension_numbers = #tpu.dot_dimension_numbers<[1], [0], [0], [1], [0, 0, 1, 1], [], []>} : vector<8x8xf32>, vector<8x288xf32>, vector<8x288xf32> -> vector<8x288xf32>
    %51 = arith.addf %45, %50 : vector<8x288xf32>
    %c0_44 = arith.constant 0 : index
    %c0_45 = arith.constant 0 : index
    %c38 = arith.constant 38 : index
    %52 = vector.load %arg1[%c0_44, %c0_45, %c38] : memref<1x8x384xf32, #tpu.memory_space<vmem>>, vector<1x8x288xf32>
    %53 = vector.shape_cast %52 : vector<1x8x288xf32> to vector<8x288xf32>
    %c8 = arith.constant 8 : index
    %c0_46 = arith.constant 0 : index
    %c0_47 = arith.constant 0 : index
    %54 = vector.load %arg2[%c8, %c0_46, %c0_47] : memref<9x8x8xf32, #tpu.memory_space<vmem>>, vector<1x8x8xf32>
    %55 = vector.shape_cast %54 : vector<1x8x8xf32> to vector<8x8xf32>
    %cst_48 = arith.constant dense<0.000000e+00> : vector<8x288xf32>
    %56 = tpu.matmul %55, %53, %cst_48 {dimension_numbers = #tpu.dot_dimension_numbers<[1], [0], [0], [1], [0, 0, 1, 1], [], []>} : vector<8x8xf32>, vector<8x288xf32>, vector<8x288xf32> -> vector<8x288xf32>
    %57 = arith.addf %51, %56 : vector<8x288xf32>
    %c0_49 = arith.constant 0 : index
    %c0_50 = arith.constant 0 : index
    %c0_51 = arith.constant 0 : index
    %58 = vector.load %arg4[%c0_49, %c0_50, %c0_51] : memref<1x8x288xf32, #tpu.memory_space<vmem>>, vector<1x8x288xf32>
    %59 = vector.shape_cast %58 : vector<1x8x288xf32> to vector<8x288xf32>
    %60 = vector.shape_cast %57 : vector<8x288xf32> to vector<1x8x288xf32>
    tpu.vector_store %arg4[%c0_49, %c0_50, %c0_51], %60 {strides = array<i32>} : memref<1x8x288xf32, #tpu.memory_space<vmem>>, vector<1x8x288xf32>,
    %c0_52 = arith.constant 0 : index
    %c0_53 = arith.constant 0 : index
    %61 = vector.load %arg3[%c0_52, %c0_53] : memref<1x288xf32, #tpu.memory_space<vmem>>, vector<1x288xf32>
    %62 = vector.broadcast %61 : vector<1x288xf32> to vector<8x288xf32>
    %63 = arith.mulf %57, %62 : vector<8x288xf32>
    %c0_54 = arith.constant 0 : index
    %c0_55 = arith.constant 0 : index
    %64 = vector.load %arg5[%c0_54, %c0_55] : memref<8x1xf32, #tpu.memory_space<vmem>>, vector<8x1xf32>
    %cst_56 = arith.constant dense<0.000000e+00> : vector<8xf32>
    %65 = vector.multi_reduction <add>, %63, %cst_56 [1] : vector<8x288xf32> to vector<8xf32>
    %66 = vector.shape_cast %65 : vector<8xf32> to vector<8x1xf32>
    %67 = arith.addf %64, %66 : vector<8x1xf32>
    %c0_57 = arith.constant 0 : index
    %c0_58 = arith.constant 0 : index
    %68 = vector.load %arg5[%c0_57, %c0_58] : memref<8x1xf32, #tpu.memory_space<vmem>>, vector<8x1xf32>
    tpu.vector_store %arg5[%c0_57, %c0_58], %67 {strides = array<i32>} : memref<8x1xf32, #tpu.memory_space<vmem>>, vector<8x1xf32>,
    %c0_59 = arith.constant 0 : index
    %c0_60 = arith.constant 0 : index
    %69 = vector.load %arg6[%c0_59, %c0_60] : memref<8x1xf32, #tpu.memory_space<vmem>>, vector<8x1xf32>
    %70 = arith.mulf %63, %57 : vector<8x288xf32>
    %cst_61 = arith.constant dense<0.000000e+00> : vector<8xf32>
    %71 = vector.multi_reduction <add>, %70, %cst_61 [1] : vector<8x288xf32> to vector<8xf32>
    %72 = vector.shape_cast %71 : vector<8xf32> to vector<8x1xf32>
    %73 = arith.addf %69, %72 : vector<8x1xf32>
    %c0_62 = arith.constant 0 : index
    %c0_63 = arith.constant 0 : index
    %74 = vector.load %arg6[%c0_62, %c0_63] : memref<8x1xf32, #tpu.memory_space<vmem>>, vector<8x1xf32>
    tpu.vector_store %arg6[%c0_62, %c0_63], %73 {strides = array<i32>} : memref<8x1xf32, #tpu.memory_space<vmem>>, vector<8x1xf32>,
    return
  }
  func.func @transform_0(%arg0: i32) -> (i32, i32, i32) {
    %c0_i32 = arith.constant 0 : i32
    %c0_i32_0 = arith.constant 0 : i32
    %c0_i32_1 = arith.constant 0 : i32
    return %arg0, %c0_i32, %c0_i32_0 : i32, i32, i32
  }
  func.func @transform_1(%arg0: i32) -> (i32, i32, i32) {
    %c0_i32 = arith.constant 0 : i32
    %c0_i32_0 = arith.constant 0 : i32
    %c0_i32_1 = arith.constant 0 : i32
    %c0_i32_2 = arith.constant 0 : i32
    return %c0_i32, %c0_i32_0, %c0_i32_1 : i32, i32, i32
  }
  func.func @transform_2(%arg0: i32) -> (i32, i32) {
    %c0_i32 = arith.constant 0 : i32
    %c0_i32_0 = arith.constant 0 : i32
    %c0_i32_1 = arith.constant 0 : i32
    return %c0_i32, %c0_i32_0 : i32, i32
  }
  func.func @transform_3(%arg0: i32) -> (i32, i32, i32) {
    %c0_i32 = arith.constant 0 : i32
    %c0_i32_0 = arith.constant 0 : i32
    %c0_i32_1 = arith.constant 0 : i32
    return %arg0, %c0_i32, %c0_i32_0 : i32, i32, i32
  }
  func.func @transform_4(%arg0: i32) -> (i32, i32) {
    %c0_i32 = arith.constant 0 : i32
    %c0_i32_0 = arith.constant 0 : i32
    %c0_i32_1 = arith.constant 0 : i32
    return %c0_i32, %c0_i32_0 : i32, i32
  }
  func.func @transform_5(%arg0: i32) -> (i32, i32) {
    %c0_i32 = arith.constant 0 : i32
    %c0_i32_0 = arith.constant 0 : i32
    %c0_i32_1 = arith.constant 0 : i32
    return %c0_i32, %c0_i32_0 : i32, i32
  }
}

module attributes {stable_mosaic.version = 11 : i64} {
  func.func @_bn_prelu_kernel(%arg0: i32, %arg1: memref<1x8x288xf32, #tpu.memory_space<vmem>>, %arg2: memref<8x1xf32, #tpu.memory_space<vmem>>, %arg3: memref<8x1xf32, #tpu.memory_space<vmem>>, %arg4: memref<8x1xf32, #tpu.memory_space<vmem>>, %arg5: memref<8x1xf32, #tpu.memory_space<vmem>>, %arg6: memref<8x1xf32, #tpu.memory_space<vmem>>, %arg7: memref<1x8x288xf32, #tpu.memory_space<vmem>>) attributes {dimension_semantics = [#tpu.dimension_semantics<parallel>], iteration_bounds = array<i64: 2>, scalar_prefetch = 0 : i64, scratch_operands = 0 : i64, tpu.core_type = #tpu.core_type<tc>, window_params = [{transform_indices = @transform_0, window_bounds = array<i64: 1, 8, 288>}, {pipeline_mode = #tpu.pipeline_mode<synchronous>, transform_indices = @transform_1, window_bounds = array<i64: 8, 1>}, {pipeline_mode = #tpu.pipeline_mode<synchronous>, transform_indices = @transform_2, window_bounds = array<i64: 8, 1>}, {pipeline_mode = #tpu.pipeline_mode<synchronous>, transform_indices = @transform_3, window_bounds = array<i64: 8, 1>}, {pipeline_mode = #tpu.pipeline_mode<synchronous>, transform_indices = @transform_4, window_bounds = array<i64: 8, 1>}, {pipeline_mode = #tpu.pipeline_mode<synchronous>, transform_indices = @transform_5, window_bounds = array<i64: 8, 1>}, {transform_indices = @transform_6, window_bounds = array<i64: 1, 8, 288>}]} {
    %c0 = arith.constant 0 : index
    %c0_0 = arith.constant 0 : index
    %c0_1 = arith.constant 0 : index
    %0 = vector.load %arg1[%c0, %c0_0, %c0_1] : memref<1x8x288xf32, #tpu.memory_space<vmem>>, vector<1x8x288xf32>
    %1 = vector.shape_cast %0 : vector<1x8x288xf32> to vector<8x288xf32>
    %c0_2 = arith.constant 0 : index
    %c0_3 = arith.constant 0 : index
    %2 = vector.load %arg2[%c0_2, %c0_3] : memref<8x1xf32, #tpu.memory_space<vmem>>, vector<8x1xf32>
    %cst = arith.constant 0.001953125 : f32
    %3 = vector.broadcast %cst : f32 to vector<8x1xf32>
    %4 = arith.mulf %2, %3 : vector<8x1xf32>
    %c0_4 = arith.constant 0 : index
    %c0_5 = arith.constant 0 : index
    %5 = vector.load %arg3[%c0_4, %c0_5] : memref<8x1xf32, #tpu.memory_space<vmem>>, vector<8x1xf32>
    %cst_6 = arith.constant 0.001953125 : f32
    %6 = vector.broadcast %cst_6 : f32 to vector<8x1xf32>
    %7 = arith.mulf %5, %6 : vector<8x1xf32>
    %8 = arith.mulf %4, %4 : vector<8x1xf32>
    %9 = arith.subf %7, %8 : vector<8x1xf32>
    %cst_7 = arith.constant 9.99999974E-6 : f32
    %10 = vector.broadcast %cst_7 : f32 to vector<8x1xf32>
    %11 = arith.addf %9, %10 : vector<8x1xf32>
    %12 = math.rsqrt %11 : vector<8x1xf32>
    %c0_8 = arith.constant 0 : index
    %c0_9 = arith.constant 0 : index
    %13 = vector.load %arg4[%c0_8, %c0_9] : memref<8x1xf32, #tpu.memory_space<vmem>>, vector<8x1xf32>
    %14 = arith.mulf %12, %13 : vector<8x1xf32>
    %15 = vector.broadcast %4 : vector<8x1xf32> to vector<8x288xf32>
    %16 = arith.subf %1, %15 : vector<8x288xf32>
    %17 = vector.broadcast %14 : vector<8x1xf32> to vector<8x288xf32>
    %18 = arith.mulf %16, %17 : vector<8x288xf32>
    %c0_10 = arith.constant 0 : index
    %c0_11 = arith.constant 0 : index
    %19 = vector.load %arg5[%c0_10, %c0_11] : memref<8x1xf32, #tpu.memory_space<vmem>>, vector<8x1xf32>
    %20 = vector.broadcast %19 : vector<8x1xf32> to vector<8x288xf32>
    %21 = arith.addf %18, %20 : vector<8x288xf32>
    %cst_12 = arith.constant 0.000000e+00 : f32
    %22 = vector.broadcast %cst_12 : f32 to vector<8x288xf32>
    %23 = arith.cmpf ogt, %21, %22 : vector<8x288xf32>
    %c0_13 = arith.constant 0 : index
    %c0_14 = arith.constant 0 : index
    %24 = vector.load %arg6[%c0_13, %c0_14] : memref<8x1xf32, #tpu.memory_space<vmem>>, vector<8x1xf32>
    %25 = vector.broadcast %24 : vector<8x1xf32> to vector<8x288xf32>
    %26 = arith.mulf %25, %21 : vector<8x288xf32>
    %27 = arith.select %23, %21, %26 : vector<8x288xi1>, vector<8x288xf32>
    %c0_15 = arith.constant 0 : index
    %c0_16 = arith.constant 0 : index
    %c0_17 = arith.constant 0 : index
    %28 = vector.load %arg7[%c0_15, %c0_16, %c0_17] : memref<1x8x288xf32, #tpu.memory_space<vmem>>, vector<1x8x288xf32>
    %29 = vector.shape_cast %28 : vector<1x8x288xf32> to vector<8x288xf32>
    %30 = vector.shape_cast %27 : vector<8x288xf32> to vector<1x8x288xf32>
    tpu.vector_store %arg7[%c0_15, %c0_16, %c0_17], %30 {strides = array<i32>} : memref<1x8x288xf32, #tpu.memory_space<vmem>>, vector<1x8x288xf32>,
    return
  }
  func.func @transform_0(%arg0: i32) -> (i32, i32, i32) {
    %c0_i32 = arith.constant 0 : i32
    %c0_i32_0 = arith.constant 0 : i32
    %c0_i32_1 = arith.constant 0 : i32
    return %arg0, %c0_i32, %c0_i32_0 : i32, i32, i32
  }
  func.func @transform_1(%arg0: i32) -> (i32, i32) {
    %c0_i32 = arith.constant 0 : i32
    %c0_i32_0 = arith.constant 0 : i32
    %c0_i32_1 = arith.constant 0 : i32
    return %c0_i32, %c0_i32_0 : i32, i32
  }
  func.func @transform_2(%arg0: i32) -> (i32, i32) {
    %c0_i32 = arith.constant 0 : i32
    %c0_i32_0 = arith.constant 0 : i32
    %c0_i32_1 = arith.constant 0 : i32
    return %c0_i32, %c0_i32_0 : i32, i32
  }
  func.func @transform_3(%arg0: i32) -> (i32, i32) {
    %c0_i32 = arith.constant 0 : i32
    %c0_i32_0 = arith.constant 0 : i32
    %c0_i32_1 = arith.constant 0 : i32
    return %c0_i32, %c0_i32_0 : i32, i32
  }
  func.func @transform_4(%arg0: i32) -> (i32, i32) {
    %c0_i32 = arith.constant 0 : i32
    %c0_i32_0 = arith.constant 0 : i32
    %c0_i32_1 = arith.constant 0 : i32
    return %c0_i32, %c0_i32_0 : i32, i32
  }
  func.func @transform_5(%arg0: i32) -> (i32, i32) {
    %c0_i32 = arith.constant 0 : i32
    %c0_i32_0 = arith.constant 0 : i32
    %c0_i32_1 = arith.constant 0 : i32
    return %c0_i32, %c0_i32_0 : i32, i32
  }
  func.func @transform_6(%arg0: i32) -> (i32, i32, i32) {
    %c0_i32 = arith.constant 0 : i32
    %c0_i32_0 = arith.constant 0 : i32
    %c0_i32_1 = arith.constant 0 : i32
    return %arg0, %c0_i32, %c0_i32_0 : i32, i32, i32
  }
}

</mosaic_0001>

<bundles_post_ra>
// kernel: conv_bn_prelu.3
= control target key start
LH: loop header
LB: loop body
LE: loop exit
PB: predicated region body
PF: predicated region fallthrough
CT: control target
= control target key end

     0   :  { %s431_s21 = smov 0   ;;  %s463_s0 = inlined_call_operand.vmem [shape: f32[2,8,288], index: 0, kind: input, shape index: {}]   ;;  %s464_s1 = inlined_call_operand.vmem [shape: f32[8,1], index: 1, kind: input, shape index: {}]   ;;  %s465_s2 = inlined_call_operand.vmem [shape: f32[8,1], index: 2, kind: input, shape index: {}]   ;;  %s466_s3 = inlined_call_operand.vmem [shape: f32[8,1], index: 3, kind: input, shape index: {}]   ;;  %s467_s4 = inlined_call_operand.vmem [shape: f32[8,1], index: 4, kind: input, shape index: {}]   ;;  %s468_s5 = inlined_call_operand.vmem [shape: f32[8,1], index: 5, kind: input, shape index: {}]   ;;  %s469_s6 = inlined_call_operand.vmem [shape: f32[2,8,288], index: 6, kind: output, shape index: {}]  }
   0x1 LB: > { %s364_s22 = sadd.s32 4294967295, %s393_s21   ;;  %p368_p0 = scmp.ge.s32.totalorder %s393_s21, 1  ;;  %s393_s21 = sphi %s431_s21, %s16_s21  }
   0x2   : > { %p212_p1 = scmp.lt.s32.totalorder %s393_s21, 3 }
   0x4   : > { %p213_p2 = pnand %p368_p0, %p212_p1 }
   0x5   : > { %v281_v0 = vld [vmem:[%s467_s4] sm:$0xff] (!%p213_p2)  ;;  %v395_v3 = vmov (!%p213_p2), 0   ;;  %p242_p3 = scmp.lt.s32.totalorder (!%p213_p2), %s364_s22, 1  ;;  %vm307_vm3 = vcmask (!%p213_p2), 261120  }
   0x6   : > { %216 = sbr.rel (%p213_p2) target bundleno = 165 (0xa5), region = 44  ;;  %v255_v1 = vld [vmem:[%s464_s1] sm:$0xff] (!%p213_p2)  ;;  %384 = vset.pattern.permute.xlu1 (!%p213_p2), %v395_v3  ;;  %383 = vset.pattern.permute.xlu0 (!%p213_p2), %v395_v3 }
   0x7   : > { %v257_v2 = vld [vmem:[%s465_s2] sm:$0xff] (!%p213_p2)  ;;  %v256_v4 = vmul.f32 (!%p213_p2), 0.001953125, %v255_v1  ;;  %284 = vperm.xlu1 (!%p213_p2), %384, %v281_v0  }
   0x8   : > { %v258_v5 = vmul.f32 (!%p213_p2), 0.001953125, %v257_v2  ;;  %v293_v7 = vld [vmem:[%s468_s5] sm:$0xff] (!%p213_p2) }
   0x9   : > { %267 = vperm.xlu0 (!%p213_p2), %383, %v256_v4   ;;  %v259_v6 = vmul.f32 (!%p213_p2), %v256_v4, %v256_v4  ;;  %v263_v10 = vld [vmem:[%s466_s3] sm:$0xff] (!%p213_p2) }
   0xb   : > { %v260_v8 = vsub.f32 (!%p213_p2), %v258_v5, %v259_v6  ;;  %296 = vperm.xlu1 (!%p213_p2), %384, %v293_v7  }
   0xd   : > { %v261_v9 = vadd.f32 1e-05, %v260_v8  ;;  %s471_s22 = smov (!%p242_p3, %s364_s22), 1 }
   0xe   : > { %s373_s9 = smul.u32 24, %s471_s22 }
   0xf   : > { %385 = vrsqrt.f32 %v261_v9 }
  0x10   : > { %s246_s12 = scalar_lea.vmem %s463_s0, %s373_s9  ;;  %s251_s15 = scalar_lea.vmem %s469_s6, %s373_s9 }
  0x11   : > { %v252_v14 = vld [vmem:[%s246_s12] sm:$0xff]  ;;  %v253_v15 = vld [vmem:[%s246_s12 + $0x8] sm:$0xff]  ;;  %v254_v16 = vld [vmem:[%s246_s12 + $0x10] sm:$0xff] }
  0x19   : > { %v386_v11 = vpop.eup %385 }
  0x1a   : > { %v264_v12 = vmul.f32 %v386_v11, %v263_v10 }
  0x1c   : > { %275 = vperm.xlu0 %383, %v264_v12  }
  0x86   : > { %v285_v17 = vpop.permute.xlu1 %284 }
  0x88   : > { %v268_v13 = vpop.permute.xlu0 %267 }
  0x89   : > { %v270_v18 = vsub.f32 %v252_v14, %v268_v13  ;;  %v271_v19 = vsub.f32 %v253_v15, %v268_v13  ;;  %v272_v20 = vsub.f32 %v254_v16, %v268_v13 }
  0x8a   : > { %v297_v28 = vpop.permute.xlu1 %296 }
  0x9b   : > { %v276_v21 = vpop.permute.xlu0 %275 }
  0x9c   : > { %v278_v22 = vmul.f32 %v276_v21, %v270_v18  ;;  %v279_v23 = vmul.f32 %v276_v21, %v271_v19  ;;  %v280_v24 = vmul.f32 %v276_v21, %v272_v20 }
  0x9e   : > { %v287_v25 = vadd.f32 %v285_v17, %v278_v22  ;;  %v288_v26 = vadd.f32 %v285_v17, %v279_v23  ;;  %v289_v27 = vadd.f32 %v285_v17, %v280_v24 }
  0xa0   : > { %vm290_vm0 = vcmp.gt.f32.partialorder %v287_v25, 0.0  ;;  %vm291_vm1 = vcmp.gt.f32.partialorder %v288_v26, 0.0  ;;  %vm292_vm2 = vcmp.gt.f32.partialorder %v289_v27, 0.0  ;;  %v299_v29 = vmul.f32 %v297_v28, %v287_v25 }
  0xa1   : > { %v300_v30 = vmul.f32 %v297_v28, %v288_v26  ;;  %v301_v31 = vmul.f32 %v297_v28, %v289_v27 }
  0xa2   : > { %v302_v32 = vsel %vm290_vm0, %v287_v25, %v299_v29 }
  0xa3   : > { %v303_v33 = vsel %vm291_vm1, %v288_v26, %v300_v30  ;;  %v304_v34 = vsel %vm292_vm2, %v289_v27, %v301_v31  ;;  %305 = vst [vmem:[%s251_s15] sm:$0xff] %v302_v32 }
  0xa4   : > { %306 = vst [vmem:[%s251_s15 + $0x8] sm:$0xff] %v303_v33  ;;  %308 = vst.msk [vmem:[%s251_s15 + $0x10] sm:$0xff] %vm307_vm3, %v304_v34 }
  0xa5 PF: > { %s16_s21 = sadd.s32 1, %s393_s21  }
  0xa6   : > { %p13_p4 = scmp.ge.s32.totalorder %s16_s21, 4  }
  0xa8   :  { %15 = sbr.rel (!%p13_p4) target bundleno = 1 (0x1), region = 74 }

// kernel: conv_bn_prelu.2
= control target key start
LH: loop header
LB: loop body
LE: loop exit
PB: predicated region body
PF: predicated region fallthrough
CT: control target
= control target key end

     0   :  { %s1975_s18 = smov 0   ;;  %s2114_s0 = inlined_call_operand.vmem [shape: f32[2,8,384], index: 0, kind: input, shape index: {}]   ;;  %s2115_s1 = inlined_call_operand.vmem [shape: f32[9,8,8], index: 1, kind: input, shape index: {}]   ;;  %s2116_s2 = inlined_call_operand.vmem [shape: f32[1,288], index: 2, kind: input, shape index: {}]   ;;  %s2117_s3 = inlined_call_operand.vmem [shape: f32[2,8,288], index: 3, kind: output, shape index: {0}]   ;;  %s2118_s4 = inlined_call_operand.vmem [shape: f32[8,1], index: 4, kind: output, shape index: {1}]   ;;  %s2119_s5 = inlined_call_operand.vmem [shape: f32[8,1], index: 5, kind: output, shape index: {2}]  }
   0x1 LB: > { %s1775_s19 = sadd.s32 4294967295, %s1932_s18   ;;  %p1779_p0 = scmp.ge.s32.totalorder %s1932_s18, 1  ;;  %s1932_s18 = sphi %s1975_s18, %s16_s18  }
   0x2   : > { %p182_p1 = scmp.lt.s32.totalorder %s1932_s18, 3 }
   0x4   : > { %p183_p2 = pnand %p1779_p0, %p182_p1 }
   0x5   : > { %p210_p3 = scmp.lt.s32.totalorder (!%p183_p2), %s1775_s19, 1  ;;  %p1782_p4 = scmp.ne.s32.totalorder (!%p183_p2), %s1775_s19, 0 }
   0x6   : > { %186 = sbr.rel (%p183_p2) target bundleno = 574 (0x23e), region = 32 }
   0xd   : > { %s211_s20 = scalar_select %p210_p3, %s1775_s19, 1 }
   0xe   : > { %223 = sbr.rel (%p1782_p4) target bundleno = 21 (0x15), region = 36  ;;  %vm224_vm0 = vcmask (!%p1782_p4), 7168   ;;  %v1934_v0 = vmov (!%p1782_p4), 0.0  }
   0xf   : > { %s1906_s21 = smul.u32 24, %s211_s20  ;;  %225 = vst.msk [vmem:[%s2118_s4] sm:$0xff] (!%p1782_p4), %vm224_vm0, %v1934_v0  ;;  %226 = vst.msk [vmem:[%s2119_s5] sm:$0xff] (!%p1782_p4), %vm224_vm0, %v1934_v0 }
  0x11   : > { %s214_s24 = scalar_lea.vmem %s2114_s0, %s1906_s21  ;;  %s1989_s27 = scalar_lea.vmem %s2117_s3, %s1906_s21 }
  0x15 PF: > { %v228_v1 = vld [vmem:[%s214_s24 + $0x8] sm:$0xff]  ;;  %v227_v2 = vld [vmem:[%s214_s24] sm:$0xff]  ;;  %s1935_s7 = smov 127   ;;  %v229_v3 = vld [vmem:[%s214_s24 + $0x10] sm:$0xff]  ;;  %v1936_v4 = vmov 0.0   ;;  %vm1937_vm1 = vmmov 0   ;;  %v1670_v54 = vlaneseq }
  0x16   : > { %238 = vrot.lane.b32.xlu0 %v228_v1, %s1935_s7  ;;  %236 = vrot.lane.b32.xlu1 %v227_v2, %s1935_s7  ;;  %s1938_s8 = smov 126   ;;  %s1939_s9 = smov 110   ;;  %vm242_vm2 = vcmask 1039360   ;;  %v1783_v7 = vld [vmem:[%s2115_s1 + $0x8] sm:$0xff]  ;;  %vm248_vm3 = vcmask 64512   ;;  %vm545_vm4 = vcmask 1031168  }
  0x17   : > { %1829 = vmatprep.subr.mxu1 %v1936_v4  ;;  %1831 = vmatprep.mubr.msk.f32.mxu1 %vm1937_vm1, %v1936_v4  ;;  %s1940_s10 = smov 109   ;;  %s1941_s11 = smov 108   ;;  %v230_v15 = vld [vmem:[%s2115_s1] sm:$0xff]  ;;  %vm706_vm5 = vcmask 900096   ;;  %v1788_v22 = vld [vmem:[%s2115_s1 + $0x10] sm:$0xff]  ;;  %vm867_vm6 = vcmask 891904  }
  0x18   : > { %316 = vmatprep.mubr.f32.mxu0 %v1936_v4  ;;  %s1942_s12 = smov 92   ;;  %s1943_s13 = smov 91   ;;  %v1791_v28 = vld [vmem:[%s2115_s1 + $0x18] sm:$0xff]  ;;  %vm1028_vm7 = vcmask 883712   ;;  %v1794_v34 = vld [vmem:[%s2115_s1 + $0x20] sm:$0xff]  ;;  %vm1189_vm8 = vcmask 752640  }
  0x19   : > { %s1944_s14 = smov 90   ;;  %v1797_v40 = vld [vmem:[%s2115_s1 + $0x28] sm:$0xff]  ;;  %vm1350_vm9 = vcmask 744448   ;;  %v1800_v45 = vld [vmem:[%s2115_s1 + $0x30] sm:$0xff]  ;;  %vm1511_vm10 = vcmask 736256   ;;  %v1803_v51 = vld [vmem:[%s2115_s1 + $0x38] sm:$0xff] }
  0x1a   : > { %240 = vrot.lane.b32.xlu0 %v229_v3, %s1935_s7  ;;  %541 = vrot.lane.b32.xlu1 %v228_v1, %s1938_s8  ;;  %v1806_v53 = vld [vmem:[%s2115_s1 + $0x40] sm:$0xff]  ;;  %v1671_v55 = vshrl.u32 %v1670_v54, 7  ;;  %vm1666_vm11 = vcmask 261120   ;;  %vm1695_vm12 = vcmask 7168  }
  0x1b   : > { %v1668_v57 = vld [vmem:[%s2116_s2] sm:$0x7] }
  0x1c   : > { %v1680_v56 = vsub.s32 2, %v1671_v55  ;;  %v1672_v58 = vsub.s32 0, %v1671_v55  ;;  %v1676_v59 = vsub.s32 1, %v1671_v55 }
  0x1e   : > { %543 = vrot.lane.b32.xlu0 %v229_v3, %s1938_s8  ;;  %539 = vrot.lane.b32.xlu1 %v227_v2, %s1938_s8  ;;  %v1681_v60 = vrot.slane %v1668_v57, %v1680_v56  ;;  %v1673_v61 = vrot.slane %v1668_v57, %v1672_v58  ;;  %v1677_v63 = vrot.slane %v1668_v57, %v1676_v59 }
  0x22   : > { %702 = vrot.lane.b32.xlu0 %v228_v1, %s1939_s9  ;;  %704 = vrot.lane.b32.xlu1 %v229_v3, %s1939_s9 }
  0x26   : > { %700 = vrot.lane.b32.xlu0 %v227_v2, %s1939_s9  ;;  %863 = vrot.lane.b32.xlu1 %v228_v1, %s1940_s10 }
  0x2a   : > { %865 = vrot.lane.b32.xlu0 %v229_v3, %s1940_s10  ;;  %861 = vrot.lane.b32.xlu1 %v227_v2, %s1940_s10 }
  0x2e   : > { %1024 = vrot.lane.b32.xlu0 %v228_v1, %s1941_s11  ;;  %1026 = vrot.lane.b32.xlu1 %v229_v3, %s1941_s11 }
  0x32   : > { %1022 = vrot.lane.b32.xlu0 %v227_v2, %s1941_s11  ;;  %1185 = vrot.lane.b32.xlu1 %v228_v1, %s1942_s12 }
  0x36   : > { %1187 = vrot.lane.b32.xlu0 %v229_v3, %s1942_s12  ;;  %1183 = vrot.lane.b32.xlu1 %v227_v2, %s1942_s12 }
  0x3a   : > { %1346 = vrot.lane.b32.xlu0 %v228_v1, %s1943_s13  ;;  %1348 = vrot.lane.b32.xlu1 %v229_v3, %s1943_s13 }
  0x3e   : > { %1344 = vrot.lane.b32.xlu0 %v227_v2, %s1943_s13  ;;  %1507 = vrot.lane.b32.xlu1 %v228_v1, %s1944_s14 }
  0x42   : > { %1509 = vrot.lane.b32.xlu0 %v229_v3, %s1944_s14  ;;  %1505 = vrot.lane.b32.xlu1 %v227_v2, %s1944_s14 }
  0x88   : > { %v239_v5 = vpop.permute.xlu0 %238  ;;  %v237_v6 = vpop.permute.xlu1 %236 }
  0x89   : > { %v243_v11 = vsel %vm242_vm2, %v237_v6, %v239_v5 }
  0x8c   : > { %v241_v8 = vpop.permute.xlu0 %240  ;;  %v542_v9 = vpop.permute.xlu1 %541 }
  0x8d   : > { %1830 = vmatpush3.msra.mxu1 %v241_v8  ;;  %v244_v10 = vsel %vm242_vm2, %v239_v5, %v241_v8 }
  0x8e   : > { %252 = vmatprep.subr.mxu0 %v244_v10  ;;  %1832 = vmatmul.mubr.msk.f32.vlgmr.msra.gmra.mrb[0].mxu1 %vm248_vm3, %v1783_v7 }
  0x8f   : > { %253 = vmatpush1.msra.mxu0 %v243_v11  ;;  %1834 = vmatprep.subr.mxu1 %v1936_v4 }
  0x90   : > { %1784 = vmatmul.mubr.msk.f32.vlgmr.msra.gmra.mrb[0].mxu0 %vm248_vm3, %v1783_v7  ;;  %396 = vmatprep.subr.mxu0 %v228_v1  ;;  %v544_v12 = vpop.permute.xlu0 %543  ;;  %v540_v13 = vpop.permute.xlu1 %539 }
  0x91   : > { %397 = vmatpush1.msra.mxu0 %v227_v2  ;;  %1835 = vmatpush3.msra.mxu1 %v229_v3  ;;  %v547_v14 = vsel %vm545_vm4, %v542_v9, %v544_v12  ;;  %v546_v18 = vsel %vm545_vm4, %v540_v13, %v542_v9 }
  0x92   : > { %1836 = vmatprep.mubr.msk.f32.mxu1 %vm1937_vm1, %v1936_v4  ;;  %554 = vmatprep.subr.mxu0 %v547_v14 }
  0x93   : > { %1839 = vmatprep.subr.mxu1 %v1936_v4  ;;  %460 = vmatprep.mubr.f32.mxu0 %v1936_v4 }
  0x94   : > { %v703_v16 = vpop.permute.xlu0 %702  ;;  %v705_v17 = vpop.permute.xlu1 %704 }
  0x95   : > { %v708_v19 = vsel %vm706_vm5, %v703_v16, %v705_v17 }
  0x96   : > { %1837 = vmatmul.mubr.msk.f32.vlgmr.msra.gmra.mrb[0].mxu1 %vm248_vm3, %v230_v15 }
  0x97   : > { %1840 = vmatpush3.msra.mxu1 %v544_v12  ;;  %1841 = vmatprep.mubr.msk.f32.mxu1 %vm1937_vm1, %v1936_v4 }
  0x98   : > { %1786 = vmatmul.mubr.msk.f32.vlgmr.msra.gmra.mrb[0].mxu0 %vm248_vm3, %v230_v15  ;;  %v701_v20 = vpop.permute.xlu0 %700  ;;  %1844 = vmatprep.subr.mxu1 %v1936_v4  ;;  %v864_v21 = vpop.permute.xlu1 %863  ;;  %v1688_v15 = vld [vmem:[%s2118_s4] sm:$0xff] }
  0x99   : > { %555 = vmatpush1.msra.mxu0 %v546_v18  ;;  %618 = vmatprep.mubr.f32.mxu0 %v1936_v4  ;;  %v707_v24 = vsel %vm706_vm5, %v701_v20, %v703_v16 }
  0x9a   : > { %715 = vmatprep.subr.mxu0 %v708_v19 }
  0x9c   : > { %v866_v23 = vpop.permute.xlu0 %865  ;;  %v862_v26 = vpop.permute.xlu1 %861 }
  0x9d   : > { %v869_v25 = vsel %vm867_vm6, %v864_v21, %v866_v23  ;;  %v868_v30 = vsel %vm867_vm6, %v862_v26, %v864_v21 }
  0x9e   : > { %1842 = vmatmul.mubr.msk.f32.vlgmr.msra.gmra.mrb[0].mxu1 %vm248_vm3, %v1788_v22 }
  0x9f   : > { %1845 = vmatpush3.msra.mxu1 %v705_v17  ;;  %1846 = vmatprep.mubr.msk.f32.mxu1 %vm1937_vm1, %v1936_v4  ;;  %v1697_v17 = vld [vmem:[%s2119_s5] sm:$0xff] }
  0xa0   : > { %1789 = vmatmul.mubr.msk.f32.vlgmr.msra.gmra.mrb[0].mxu0 %vm248_vm3, %v1788_v22  ;;  %1849 = vmatprep.subr.mxu1 %v1936_v4  ;;  %v1025_v27 = vpop.permute.xlu0 %1024  ;;  %v1027_v29 = vpop.permute.xlu1 %1026 }
  0xa1   : > { %716 = vmatpush1.msra.mxu0 %v707_v24  ;;  %779 = vmatprep.mubr.f32.mxu0 %v1936_v4  ;;  %v1030_v31 = vsel %vm1028_vm7, %v1025_v27, %v1027_v29 }
  0xa2   : > { %876 = vmatprep.subr.mxu0 %v869_v25 }
  0xa4   : > { %v1023_v32 = vpop.permute.xlu0 %1022  ;;  %v1186_v33 = vpop.permute.xlu1 %1185 }
  0xa5   : > { %v1029_v36 = vsel %vm1028_vm7, %v1023_v32, %v1025_v27 }
  0xa6   : > { %1847 = vmatmul.mubr.msk.f32.vlgmr.msra.gmra.mrb[0].mxu1 %vm248_vm3, %v1791_v28 }
  0xa7   : > { %1850 = vmatpush3.msra.mxu1 %v866_v23  ;;  %1851 = vmatprep.mubr.msk.f32.mxu1 %vm1937_vm1, %v1936_v4 }
  0xa8   : > { %1792 = vmatmul.mubr.msk.f32.vlgmr.msra.gmra.mrb[0].mxu0 %vm248_vm3, %v1791_v28  ;;  %1854 = vmatprep.subr.mxu1 %v1936_v4  ;;  %v1188_v35 = vpop.permute.xlu0 %1187  ;;  %v1184_v38 = vpop.permute.xlu1 %1183 }
  0xa9   : > { %877 = vmatpush1.msra.mxu0 %v868_v30  ;;  %940 = vmatprep.mubr.f32.mxu0 %v1936_v4  ;;  %v1191_v37 = vsel %vm1189_vm8, %v1186_v33, %v1188_v35  ;;  %v1190_v42 = vsel %vm1189_vm8, %v1184_v38, %v1186_v33 }
  0xaa   : > { %1037 = vmatprep.subr.mxu0 %v1030_v31 }
  0xac   : > { %v1347_v39 = vpop.permute.xlu0 %1346  ;;  %v1349_v41 = vpop.permute.xlu1 %1348 }
  0xad   : > { %v1352_v43 = vsel %vm1350_vm9, %v1347_v39, %v1349_v41 }
  0xae   : > { %1852 = vmatmul.mubr.msk.f32.vlgmr.msra.gmra.mrb[0].mxu1 %vm248_vm3, %v1794_v34 }
  0xaf   : > { %1855 = vmatpush3.msra.mxu1 %v1027_v29  ;;  %1856 = vmatprep.mubr.msk.f32.mxu1 %vm1937_vm1, %v1936_v4 }
  0xb0   : > { %1795 = vmatmul.mubr.msk.f32.vlgmr.msra.gmra.mrb[0].mxu0 %vm248_vm3, %v1794_v34  ;;  %1859 = vmatprep.subr.mxu1 %v1936_v4  ;;  %v1345_v44 = vpop.permute.xlu0 %1344  ;;  %v1508_v47 = vpop.permute.xlu1 %1507 }
  0xb1   : > { %1038 = vmatpush1.msra.mxu0 %v1029_v36  ;;  %1101 = vmatprep.mubr.f32.mxu0 %v1936_v4  ;;  %v1351_v48 = vsel %vm1350_vm9, %v1345_v44, %v1347_v39 }
  0xb2   : > { %1198 = vmatprep.subr.mxu0 %v1191_v37 }
  0xb4   : > { %v1510_v46 = vpop.permute.xlu0 %1509  ;;  %v1506_v50 = vpop.permute.xlu1 %1505 }
  0xb5   : > { %v1513_v49 = vsel %vm1511_vm10, %v1508_v47, %v1510_v46  ;;  %v1512_v52 = vsel %vm1511_vm10, %v1506_v50, %v1508_v47 }
  0xb6   : > { %1857 = vmatmul.mubr.msk.f32.vlgmr.msra.gmra.mrb[0].mxu1 %vm248_vm3, %v1797_v40 }
  0xb7   : > { %1860 = vmatpush3.msra.mxu1 %v1188_v35  ;;  %1861 = vmatprep.mubr.msk.f32.mxu1 %vm1937_vm1, %v1936_v4 }
  0xb8   : > { %1798 = vmatmul.mubr.msk.f32.vlgmr.msra.gmra.mrb[0].mxu0 %vm248_vm3, %v1797_v40  ;;  %1864 = vmatprep.subr.mxu1 %v1936_v4 }
  0xb9   : > { %1199 = vmatpush1.msra.mxu0 %v1190_v42  ;;  %1262 = vmatprep.mubr.f32.mxu0 %v1936_v4 }
  0xba   : > { %1359 = vmatprep.subr.mxu0 %v1352_v43 }
  0xbe   : > { %1862 = vmatmul.mubr.msk.f32.vlgmr.msra.gmra.mrb[0].mxu1 %vm248_vm3, %v1800_v45 }
  0xbf   : > { %1865 = vmatpush3.msra.mxu1 %v1349_v41  ;;  %1866 = vmatprep.mubr.msk.f32.mxu1 %vm1937_vm1, %v1936_v4 }
  0xc0   : > { %1801 = vmatmul.mubr.msk.f32.vlgmr.msra.gmra.mrb[0].mxu0 %vm248_vm3, %v1800_v45  ;;  %1869 = vmatprep.subr.mxu1 %v1936_v4 }
  0xc1   : > { %1360 = vmatpush1.msra.mxu0 %v1351_v48  ;;  %1423 = vmatprep.mubr.f32.mxu0 %v1936_v4 }
  0xc2   : > { %1520 = vmatprep.subr.mxu0 %v1513_v49 }
  0xc6   : > { %1867 = vmatmul.mubr.msk.f32.vlgmr.msra.gmra.mrb[0].mxu1 %vm248_vm3, %v1803_v51 }
  0xc7   : > { %1870 = vmatpush3.msra.mxu1 %v1510_v46  ;;  %1871 = vmatprep.mubr.msk.f32.mxu1 %vm1937_vm1, %v1936_v4 }
  0xc8   : > { %1804 = vmatmul.mubr.msk.f32.vlgmr.msra.gmra.mrb[0].mxu0 %vm248_vm3, %v1803_v51 }
  0xc9   : > { %1521 = vmatpush1.msra.mxu0 %v1512_v52  ;;  %1584 = vmatprep.mubr.f32.mxu0 %v1936_v4 }
  0xce   : > { %1872 = vmatmul.mubr.msk.f32.vlgmr.msra.gmra.mrb[0].mxu1 %vm248_vm3, %v1806_v53 }
  0xd0   : > { %1807 = vmatmul.mubr.msk.f32.vlgmr.msra.gmra.mrb[0].mxu0 %vm248_vm3, %v1806_v53 }
 0x1a1   : > { %v1657_v62 = vpop.f32.mrb[0].mxu1 }
 0x1a2   : > { %1667 = vst.msk [vmem:[%s1989_s27 + $0x10] sm:$0xff] %vm1666_vm11, %v1657_v62  ;;  %v1687_v0 = vmul.f32 %v1681_v60, %v1657_v62  ;;  %v1873_v1 = vpop.f32.mrb[1].mxu1 }
 0x1a3   : > { %v1586_v2 = vpop.f32.mrb[0].mxu0 }
 0x1a4   : > { %1664 = vst [vmem:[%s1989_s27] sm:$0xff] %v1586_v2  ;;  %v1685_v3 = vmul.f32 %v1673_v61, %v1586_v2  ;;  %v1588_v4 = vpop.f32.mrb[1].mxu0  ;;  %v1700_v6 = vmul.f32 %v1687_v0, %v1657_v62  ;;  %v1690_v10 = vsel %vm1666_vm11, %v1687_v0, 0.0 }
 0x1a5   : > { %1665 = vst [vmem:[%s1989_s27 + $0x8] sm:$0xff] %v1588_v4  ;;  %v1686_v5 = vmul.f32 %v1677_v63, %v1588_v4 }
 0x1a6   : > { %v1698_v7 = vmul.f32 %v1685_v3, %v1586_v2  ;;  %v1702_v13 = vsel %vm1666_vm11, %v1700_v6, 0.0 }
 0x1a7   : > { %v1699_v8 = vmul.f32 %v1686_v5, %v1588_v4  ;;  %v1689_v9 = vadd.f32 %v1686_v5, %v1685_v3 }
 0x1a9   : > { %v1691_v11 = vadd.f32 %v1690_v10, %v1689_v9  ;;  %v1701_v12 = vadd.f32 %v1699_v8, %v1698_v7 }
 0x1ab   : > { %1692 = vadd.xlane.f32.xlu0 %v1691_v11  ;;  %v1703_v14 = vadd.f32 %v1702_v13, %v1701_v12 }
 0x1ad   : > { %1704 = vadd.xlane.f32.xlu1 %v1703_v14 }
 0x238   : > { %v1693_v16 = vpop.xlane.xlu0 %1692 }
 0x239   : > { %v1694_v18 = vadd.f32 %v1693_v16, %v1688_v15 }
 0x23a   : > { %v1705_v19 = vpop.xlane.xlu1 %1704 }
 0x23b   : > { %1696 = vst.msk [vmem:[%s2118_s4] sm:$0xff] %vm1695_vm12, %v1694_v18  ;;  %v1706_v20 = vadd.f32 %v1705_v19, %v1697_v17 }
 0x23d   : > { %1707 = vst.msk [vmem:[%s2119_s5] sm:$0xff] %vm1695_vm12, %v1706_v20 }
 0x23e PF: > { %s16_s18 = sadd.s32 1, %s1932_s18  }
 0x23f   : > { %p13_p5 = scmp.ge.s32.totalorder %s16_s18, 4  }
 0x241   :  { %15 = sbr.rel (!%p13_p5) target bundleno = 1 (0x1), region = 90 }

</bundles_post_ra>
